<compile_context>
chip_gen: v7x
topology: tpu7x:2x2x1
jax: 0.10.0
libtpu: 0.0.40
codegen_flags: <defaults>
</compile_context>

<pallas_src>
import functools

import numpy as np
import jax
import jax.numpy as jnp
from jax import lax
from jax.experimental import pallas as pl
from jax.experimental.pallas import tpu as pltpu


# ----------------------------------------------------------------------------
# bilinear (align_corners=True) interpolation matrix, rows sum to 1
# ----------------------------------------------------------------------------
def bilinear_matrix(n_in, n_out):
    A = np.zeros((n_out, n_in), dtype=np.float32)
    if n_in == 1:
        A[:, 0] = 1.0
        return A
    for i in range(n_out):
        s = i * (n_in - 1) / (n_out - 1)
        i0 = min(int(np.floor(s)), n_in - 2)
        f = s - i0
        A[i, i0] += 1.0 - f
        A[i, i0 + 1] += f
    return A


# ----------------------------------------------------------------------------
# Pallas kernel: one batch element per grid step (parallel over batch)
# ----------------------------------------------------------------------------
def distill_kl_kernel(ful2_ref, ful_ref, ycat_ref, wblk_ref, awT_ref, ah2_ref,
                      beff_ref, out_ref, *, T, H, W):
    # ---- folded head: both branches (y_sr, y_sd) in one matmul chain --------
    ycat = ycat_ref[0]                                           # (2h, w*C)
    beff = beff_ref[0]                                           # SMEM scalar
    v = jnp.dot(ycat, wblk_ref[...],
                preferred_element_type=jnp.float32) + beff       # (2h, w)
    vw = jnp.dot(v, awT_ref[...],
                 preferred_element_type=jnp.float32)             # (2h, W)
    up = jnp.dot(ah2_ref[...], vw,
                 preferred_element_type=jnp.float32)             # (2H, W)
    s_r = up[:H, :]                                              # (H, W)
    s_d = up[H:, :]                                              # (H, W)

    # ---- separable 5x5 / stride-1 / pad-2 max pool on ful_2 -----------------
    x = ful2_ref[0]                                              # (H, W)
    col = lax.broadcasted_iota(jnp.int32, (H, W), 1)
    row = lax.broadcasted_iota(jnp.int32, (H, W), 0)
    neg = jnp.full((H, W), -jnp.inf, dtype=x.dtype)

    hmax = x                                       # dj = 0 term
    for dj in (-2, -1, 1, 2):                      # horizontal pass: lane rolls
        rolled = pltpu.roll(x, shift=(-dj) % W, axis=1)
        valid = ((col + dj) >= 0) & ((col + dj) < W)
        hmax = jnp.maximum(hmax, jnp.where(valid, rolled, neg))

    xp = hmax                                      # di = 0 term
    for di in (-2, -1, 1, 2):                      # vertical pass: sublane rolls
        rolled = pltpu.roll(hmax, shift=(-di) % H, axis=0)
        valid = ((row + di) >= 0) & ((row + di) < H)
        xp = jnp.maximum(xp, jnp.where(valid, rolled, neg))

    # ---- KL tail -------------------------------------------------------------
    inv_T = 1.0 / T

    def logsig(z):   # stable log-sigmoid, one exp + one log per call
        return jnp.minimum(z, 0.0) - jnp.log(1.0 + jnp.exp(-jnp.abs(z)))

    r1 = jnp.maximum(s_r * xp + s_r, 0.0)
    r2 = jnp.maximum(s_d * xp + s_d, 0.0)

    p_s = logsig(r1 + r2 * inv_T)        # logsigmoid(r1 + r2 / T)
    p_s1 = logsig(x * inv_T)             # logsigmoid(ful_2 / T)

    fz = ful_ref[0] * inv_T
    log_p_t = logsig(fz)                 # stable log(sigmoid(ful / T))
    p_t = jnp.exp(log_p_t)               # sigmoid(ful / T)

    # kl_div(p_s, p_t, sum) + kl_div(p_s1, p_t, sum), per-batch partial.
    terms = p_t * (2.0 * log_p_t - p_s - p_s1)
    out_ref[...] = jnp.sum(terms, axis=0, keepdims=True)[None]   # (1, 1, W)


# ----------------------------------------------------------------------------
# wrapper
# ----------------------------------------------------------------------------
def distill_klm_pallas(ful_2, y_sr, y_sd, ful, W1, b1, W2, b2, T):
    B, _, H, Wd = ful_2.shape
    _, C, h, w = y_sr.shape

    # ---- host-side parameter folding (exact: the head is purely linear) -----
    w_eff = (W2 @ W1).reshape(C).astype(jnp.float32)                  # (C,)
    b_eff = (W2 @ b1 + b2).reshape(1).astype(jnp.float32)             # (1,) SMEM

    Ah = bilinear_matrix(h, H)                                        # (H, h)
    Aw = bilinear_matrix(w, Wd)                                       # (W, w)
    awT = jnp.asarray(Aw.T, jnp.float32)                              # (w, W)
    ah2_np = np.zeros((2 * H, 2 * h), np.float32)                     # diag(Ah, Ah)
    ah2_np[:H, :h] = Ah
    ah2_np[H:, h:] = Ah
    ah2 = jnp.asarray(ah2_np)

    # block-diagonal channel-contraction matrix (w*C, w): column j holds w_eff
    wblk = jnp.kron(jnp.eye(w, dtype=jnp.float32), w_eff.reshape(C, 1))

    # lane-friendly data layout: channels packed along lanes, rows on sublanes,
    # y_sr and y_sd stacked on the sublane axis  ->  (B, 2h, w*C)
    def to_rows(y):
        return jnp.transpose(y, (0, 2, 3, 1)).reshape(B, h, w * C)
    ycat = jnp.concatenate([to_rows(y_sr), to_rows(y_sd)], axis=1)

    ful2_2d = ful_2.reshape(B, H, Wd)
    ful_2d = ful.reshape(B, H, Wd)

    kernel = functools.partial(distill_kl_kernel, T=float(T), H=H, W=Wd)

    partial_sums = pl.pallas_call(
        kernel,
        out_shape=jax.ShapeDtypeStruct((B, 1, Wd), jnp.float32),
        grid=(B,),
        in_specs=[
            pl.BlockSpec((1, H, Wd), lambda b: (b, 0, 0)),            # ful_2
            pl.BlockSpec((1, H, Wd), lambda b: (b, 0, 0)),            # ful
            pl.BlockSpec((1, 2 * h, w * C), lambda b: (b, 0, 0)),     # stacked y
            pl.BlockSpec((w * C, w), lambda b: (0, 0)),               # wblk
            pl.BlockSpec((w, Wd), lambda b: (0, 0)),                  # Aw^T
            pl.BlockSpec((2 * H, 2 * h), lambda b: (0, 0)),           # diag(Ah,Ah)
            pl.BlockSpec(memory_space=pltpu.MemorySpace.SMEM),        # b_eff
        ],
        out_specs=pl.BlockSpec((1, 1, Wd), lambda b: (b, 0, 0)),
        compiler_params=pltpu.CompilerParams(
            dimension_semantics=("parallel",)),
    )(ful2_2d, ful_2d, ycat, wblk, awT, ah2, b_eff)

    # final reduction + T^2 / B scaling outside the kernel (no in-kernel RMW)
    return jnp.sum(partial_sums) * (float(T) ** 2) / B


# ----------------------------------------------------------------------------
# pure-JAX reference (mirrors the PyTorch forward)
# ----------------------------------------------------------------------------
def distill_klm_ref(ful_2, y_sr, y_sd, ful, W1, b1, W2, b2, T):
    B, _, H, Wd = ful_2.shape
    _, _, h, w = y_sr.shape
    Ah = jnp.asarray(bilinear_matrix(h, H))
    Aw = jnp.asarray(bilinear_matrix(w, Wd))

    x = lax.reduce_window(ful_2, -jnp.inf, lax.max,
                          (1, 1, 5, 5), (1, 1, 1, 1),
                          ((0, 0), (0, 0), (2, 2), (2, 2)))

    def branch(y):
        z = jnp.einsum('oc,bchw->bohw', W1, y) + b1[None, :, None, None]
        up = jnp.einsum('Hh,bohw,Ww->boHW', Ah, z, Aw)
        return jnp.einsum('qo,boHW->bqHW', W2, up) + b2[None, :, None, None]

    ysr = branch(y_sr)
    ysd = branch(y_sd)
    r1 = jax.nn.relu(ysr * x + ysr)
    r2 = jax.nn.relu(ysd * x + ysd)
    p_s = jax.nn.log_sigmoid(r1 + r2 / T)
    p_s1 = jax.nn.log_sigmoid(ful_2 / T)
    p_t = jax.nn.sigmoid(ful / T)
    log_p_t = jax.nn.log_sigmoid(ful / T)
    kl = jnp.sum(p_t * (log_p_t - p_s))
    kl1 = jnp.sum(p_t * (log_p_t - p_s1))
    return (kl + kl1) * T ** 2 / B


# ----------------------------------------------------------------------------
if __name__ == "__main__":
    T = 4.0
    B, H, W = 2, 16, 16
    h, w = H // 8, W // 8          # spatial size of y_sr / y_sd before x8 upsample

    key = jax.random.PRNGKey(0)
    ks = jax.random.split(key, 8)
    ful_2 = jax.random.normal(ks[0], (B, 1, H, W), jnp.float32)
    y_sr = jax.random.normal(ks[1], (B, 128, h, w), jnp.float32)
    y_sd = jax.random.normal(ks[2], (B, 128, h, w), jnp.float32)
    ful = jax.random.normal(ks[3], (B, 1, H, W), jnp.float32)

    # deterministic synthetic parameters (Conv2d 1x1 weights squeezed)
    W1 = 0.05 * jax.random.normal(ks[4], (64, 128), jnp.float32)   # fc1.weight
    b1 = 0.05 * jax.random.normal(ks[5], (64,), jnp.float32)       # fc1.bias
    W2 = 0.05 * jax.random.normal(ks[6], (1, 64), jnp.float32)     # fc2.weight
    b2 = 0.05 * jax.random.normal(ks[7], (1,), jnp.float32)        # fc2.bias

    loss = distill_klm_pallas(ful_2, y_sr, y_sd, ful, W1, b1, W2, b2, T)
    jax.block_until_ready(loss)

    ref = distill_klm_ref(ful_2, y_sr, y_sd, ful, W1, b1, W2, b2, T)
    np.testing.assert_allclose(np.asarray(loss), np.asarray(ref), rtol=1e-3, atol=1e-2)

    print("KERNEL_OK")
</pallas_src>

<mosaic_0001>
module attributes {stable_mosaic.version = 11 : i64} {
  func.func @distill_kl_kernel(%arg0: i32, %arg1: memref<1x16x16xf32, #tpu.memory_space<vmem>>, %arg2: memref<1x16x16xf32, #tpu.memory_space<vmem>>, %arg3: memref<1x4x256xf32, #tpu.memory_space<vmem>>, %arg4: memref<256x2xf32, #tpu.memory_space<vmem>>, %arg5: memref<2x16xf32, #tpu.memory_space<vmem>>, %arg6: memref<32x4xf32, #tpu.memory_space<vmem>>, %arg7: memref<1xf32, #tpu.memory_space<smem>>, %arg8: memref<1x1x16xf32, #tpu.memory_space<vmem>>) attributes {dimension_semantics = [#tpu.dimension_semantics<parallel>], iteration_bounds = array<i64: 2>, scalar_prefetch = 0 : i64, scratch_operands = 0 : i64, tpu.core_type = #tpu.core_type<tc>, window_params = [{transform_indices = @transform_0, window_bounds = array<i64: 1, 16, 16>}, {transform_indices = @transform_1, window_bounds = array<i64: 1, 16, 16>}, {transform_indices = @transform_2, window_bounds = array<i64: 1, 4, 256>}, {pipeline_mode = #tpu.pipeline_mode<synchronous>, transform_indices = @transform_3, window_bounds = array<i64: 256, 2>}, {pipeline_mode = #tpu.pipeline_mode<synchronous>, transform_indices = @transform_4, window_bounds = array<i64: 2, 16>}, {pipeline_mode = #tpu.pipeline_mode<synchronous>, transform_indices = @transform_5, window_bounds = array<i64: 32, 4>}, {transform_indices = @transform_6, window_bounds = array<i64: 1>}, {transform_indices = @transform_7, window_bounds = array<i64: 1, 1, 16>}]} {
    %c0 = arith.constant 0 : index
    %c0_0 = arith.constant 0 : index
    %c0_1 = arith.constant 0 : index
    %0 = vector.load %arg3[%c0, %c0_0, %c0_1] : memref<1x4x256xf32, #tpu.memory_space<vmem>>, vector<1x4x256xf32>
    %1 = vector.shape_cast %0 : vector<1x4x256xf32> to vector<4x256xf32>
    %c0_2 = arith.constant 0 : index
    %2 = memref.load %arg7[%c0_2] : memref<1xf32, #tpu.memory_space<smem>>
    %c0_3 = arith.constant 0 : index
    %c0_4 = arith.constant 0 : index
    %3 = vector.load %arg4[%c0_3, %c0_4] : memref<256x2xf32, #tpu.memory_space<vmem>>, vector<256x2xf32>
    %cst = arith.constant dense<0.000000e+00> : vector<4x2xf32>
    %4 = tpu.matmul %1, %3, %cst {dimension_numbers = #tpu.dot_dimension_numbers<[1], [0], [0], [1], [0, 0, 1, 1], [], []>} : vector<4x256xf32>, vector<256x2xf32>, vector<4x2xf32> -> vector<4x2xf32>
    %5 = vector.broadcast %2 : f32 to vector<4x2xf32>
    %6 = arith.addf %4, %5 : vector<4x2xf32>
    %c0_5 = arith.constant 0 : index
    %c0_6 = arith.constant 0 : index
    %7 = vector.load %arg5[%c0_5, %c0_6] : memref<2x16xf32, #tpu.memory_space<vmem>>, vector<2x16xf32>
    %cst_7 = arith.constant dense<0.000000e+00> : vector<4x16xf32>
    %8 = tpu.matmul %6, %7, %cst_7 {dimension_numbers = #tpu.dot_dimension_numbers<[1], [0], [0], [1], [0, 0, 1, 1], [], []>} : vector<4x2xf32>, vector<2x16xf32>, vector<4x16xf32> -> vector<4x16xf32>
    %c0_8 = arith.constant 0 : index
    %c0_9 = arith.constant 0 : index
    %9 = vector.load %arg6[%c0_8, %c0_9] : memref<32x4xf32, #tpu.memory_space<vmem>>, vector<32x4xf32>
    %cst_10 = arith.constant dense<0.000000e+00> : vector<32x16xf32>
    %10 = tpu.matmul %9, %8, %cst_10 {dimension_numbers = #tpu.dot_dimension_numbers<[1], [0], [0], [1], [0, 0, 1, 1], [], []>} : vector<32x4xf32>, vector<4x16xf32>, vector<32x16xf32> -> vector<32x16xf32>
    %11 = vector.extract_strided_slice %10 {offsets = [0, 0], sizes = [16, 16], strides = [1, 1]} : vector<32x16xf32> to vector<16x16xf32>
    %12 = vector.extract_strided_slice %10 {offsets = [16, 0], sizes = [16, 16], strides = [1, 1]} : vector<32x16xf32> to vector<16x16xf32>
    %c0_11 = arith.constant 0 : index
    %c0_12 = arith.constant 0 : index
    %c0_13 = arith.constant 0 : index
    %13 = vector.load %arg1[%c0_11, %c0_12, %c0_13] : memref<1x16x16xf32, #tpu.memory_space<vmem>>, vector<1x16x16xf32>
    %14 = vector.shape_cast %13 : vector<1x16x16xf32> to vector<16x16xf32>
    %15 = tpu.iota {dimensions = array<i32: 1>} : vector<16x16xi32>
    %16 = tpu.iota {dimensions = array<i32: 0>} : vector<16x16xi32>
    %cst_14 = arith.constant 0xFF800000 : f32
    %17 = vector.broadcast %cst_14 : f32 to vector<16x16xf32>
    %c2_i32 = arith.constant 2 : i32
    %18 = tpu.dynamic_rotate %14 by %c2_i32 dim 1 : vector<16x16xf32>, i32 -> vector<16x16xf32>
    %c-2_i32 = arith.constant -2 : i32
    %19 = vector.broadcast %c-2_i32 : i32 to vector<16x16xi32>
    %20 = arith.addi %15, %19 : vector<16x16xi32>
    %c0_i32 = arith.constant 0 : i32
    %21 = vector.broadcast %c0_i32 : i32 to vector<16x16xi32>
    %22 = arith.cmpi sge, %20, %21 : vector<16x16xi32>
    %c-2_i32_15 = arith.constant -2 : i32
    %23 = vector.broadcast %c-2_i32_15 : i32 to vector<16x16xi32>
    %24 = arith.addi %15, %23 : vector<16x16xi32>
    %c16_i32 = arith.constant 16 : i32
    %25 = vector.broadcast %c16_i32 : i32 to vector<16x16xi32>
    %26 = arith.cmpi slt, %24, %25 : vector<16x16xi32>
    %27 = arith.andi %22, %26 : vector<16x16xi1>
    %28 = arith.select %27, %18, %17 : vector<16x16xi1>, vector<16x16xf32>
    %29 = arith.maximumf %14, %28 : vector<16x16xf32>
    %c1_i32 = arith.constant 1 : i32
    %30 = tpu.dynamic_rotate %14 by %c1_i32 dim 1 : vector<16x16xf32>, i32 -> vector<16x16xf32>
    %c-1_i32 = arith.constant -1 : i32
    %31 = vector.broadcast %c-1_i32 : i32 to vector<16x16xi32>
    %32 = arith.addi %15, %31 : vector<16x16xi32>
    %c0_i32_16 = arith.constant 0 : i32
    %33 = vector.broadcast %c0_i32_16 : i32 to vector<16x16xi32>
    %34 = arith.cmpi sge, %32, %33 : vector<16x16xi32>
    %c-1_i32_17 = arith.constant -1 : i32
    %35 = vector.broadcast %c-1_i32_17 : i32 to vector<16x16xi32>
    %36 = arith.addi %15, %35 : vector<16x16xi32>
    %c16_i32_18 = arith.constant 16 : i32
    %37 = vector.broadcast %c16_i32_18 : i32 to vector<16x16xi32>
    %38 = arith.cmpi slt, %36, %37 : vector<16x16xi32>
    %39 = arith.andi %34, %38 : vector<16x16xi1>
    %40 = arith.select %39, %30, %17 : vector<16x16xi1>, vector<16x16xf32>
    %41 = arith.maximumf %29, %40 : vector<16x16xf32>
    %c15_i32 = arith.constant 15 : i32
    %42 = tpu.dynamic_rotate %14 by %c15_i32 dim 1 : vector<16x16xf32>, i32 -> vector<16x16xf32>
    %c1_i32_19 = arith.constant 1 : i32
    %43 = vector.broadcast %c1_i32_19 : i32 to vector<16x16xi32>
    %44 = arith.addi %15, %43 : vector<16x16xi32>
    %c0_i32_20 = arith.constant 0 : i32
    %45 = vector.broadcast %c0_i32_20 : i32 to vector<16x16xi32>
    %46 = arith.cmpi sge, %44, %45 : vector<16x16xi32>
    %c1_i32_21 = arith.constant 1 : i32
    %47 = vector.broadcast %c1_i32_21 : i32 to vector<16x16xi32>
    %48 = arith.addi %15, %47 : vector<16x16xi32>
    %c16_i32_22 = arith.constant 16 : i32
    %49 = vector.broadcast %c16_i32_22 : i32 to vector<16x16xi32>
    %50 = arith.cmpi slt, %48, %49 : vector<16x16xi32>
    %51 = arith.andi %46, %50 : vector<16x16xi1>
    %52 = arith.select %51, %42, %17 : vector<16x16xi1>, vector<16x16xf32>
    %53 = arith.maximumf %41, %52 : vector<16x16xf32>
    %c14_i32 = arith.constant 14 : i32
    %54 = tpu.dynamic_rotate %14 by %c14_i32 dim 1 : vector<16x16xf32>, i32 -> vector<16x16xf32>
    %c2_i32_23 = arith.constant 2 : i32
    %55 = vector.broadcast %c2_i32_23 : i32 to vector<16x16xi32>
    %56 = arith.addi %15, %55 : vector<16x16xi32>
    %c0_i32_24 = arith.constant 0 : i32
    %57 = vector.broadcast %c0_i32_24 : i32 to vector<16x16xi32>
    %58 = arith.cmpi sge, %56, %57 : vector<16x16xi32>
    %c2_i32_25 = arith.constant 2 : i32
    %59 = vector.broadcast %c2_i32_25 : i32 to vector<16x16xi32>
    %60 = arith.addi %15, %59 : vector<16x16xi32>
    %c16_i32_26 = arith.constant 16 : i32
    %61 = vector.broadcast %c16_i32_26 : i32 to vector<16x16xi32>
    %62 = arith.cmpi slt, %60, %61 : vector<16x16xi32>
    %63 = arith.andi %58, %62 : vector<16x16xi1>
    %64 = arith.select %63, %54, %17 : vector<16x16xi1>, vector<16x16xf32>
    %65 = arith.maximumf %53, %64 : vector<16x16xf32>
    %c2_i32_27 = arith.constant 2 : i32
    %66 = tpu.dynamic_rotate %65 by %c2_i32_27 dim 0 : vector<16x16xf32>, i32 -> vector<16x16xf32>
    %c-2_i32_28 = arith.constant -2 : i32
    %67 = vector.broadcast %c-2_i32_28 : i32 to vector<16x16xi32>
    %68 = arith.addi %16, %67 : vector<16x16xi32>
    %c0_i32_29 = arith.constant 0 : i32
    %69 = vector.broadcast %c0_i32_29 : i32 to vector<16x16xi32>
    %70 = arith.cmpi sge, %68, %69 : vector<16x16xi32>
    %c-2_i32_30 = arith.constant -2 : i32
    %71 = vector.broadcast %c-2_i32_30 : i32 to vector<16x16xi32>
    %72 = arith.addi %16, %71 : vector<16x16xi32>
    %c16_i32_31 = arith.constant 16 : i32
    %73 = vector.broadcast %c16_i32_31 : i32 to vector<16x16xi32>
    %74 = arith.cmpi slt, %72, %73 : vector<16x16xi32>
    %75 = arith.andi %70, %74 : vector<16x16xi1>
    %76 = arith.select %75, %66, %17 : vector<16x16xi1>, vector<16x16xf32>
    %77 = arith.maximumf %65, %76 : vector<16x16xf32>
    %c1_i32_32 = arith.constant 1 : i32
    %78 = tpu.dynamic_rotate %65 by %c1_i32_32 dim 0 : vector<16x16xf32>, i32 -> vector<16x16xf32>
    %c-1_i32_33 = arith.constant -1 : i32
    %79 = vector.broadcast %c-1_i32_33 : i32 to vector<16x16xi32>
    %80 = arith.addi %16, %79 : vector<16x16xi32>
    %c0_i32_34 = arith.constant 0 : i32
    %81 = vector.broadcast %c0_i32_34 : i32 to vector<16x16xi32>
    %82 = arith.cmpi sge, %80, %81 : vector<16x16xi32>
    %c-1_i32_35 = arith.constant -1 : i32
    %83 = vector.broadcast %c-1_i32_35 : i32 to vector<16x16xi32>
    %84 = arith.addi %16, %83 : vector<16x16xi32>
    %c16_i32_36 = arith.constant 16 : i32
    %85 = vector.broadcast %c16_i32_36 : i32 to vector<16x16xi32>
    %86 = arith.cmpi slt, %84, %85 : vector<16x16xi32>
    %87 = arith.andi %82, %86 : vector<16x16xi1>
    %88 = arith.select %87, %78, %17 : vector<16x16xi1>, vector<16x16xf32>
    %89 = arith.maximumf %77, %88 : vector<16x16xf32>
    %c15_i32_37 = arith.constant 15 : i32
    %90 = tpu.dynamic_rotate %65 by %c15_i32_37 dim 0 : vector<16x16xf32>, i32 -> vector<16x16xf32>
    %c1_i32_38 = arith.constant 1 : i32
    %91 = vector.broadcast %c1_i32_38 : i32 to vector<16x16xi32>
    %92 = arith.addi %16, %91 : vector<16x16xi32>
    %c0_i32_39 = arith.constant 0 : i32
    %93 = vector.broadcast %c0_i32_39 : i32 to vector<16x16xi32>
    %94 = arith.cmpi sge, %92, %93 : vector<16x16xi32>
    %c1_i32_40 = arith.constant 1 : i32
    %95 = vector.broadcast %c1_i32_40 : i32 to vector<16x16xi32>
    %96 = arith.addi %16, %95 : vector<16x16xi32>
    %c16_i32_41 = arith.constant 16 : i32
    %97 = vector.broadcast %c16_i32_41 : i32 to vector<16x16xi32>
    %98 = arith.cmpi slt, %96, %97 : vector<16x16xi32>
    %99 = arith.andi %94, %98 : vector<16x16xi1>
    %100 = arith.select %99, %90, %17 : vector<16x16xi1>, vector<16x16xf32>
    %101 = arith.maximumf %89, %100 : vector<16x16xf32>
    %c14_i32_42 = arith.constant 14 : i32
    %102 = tpu.dynamic_rotate %65 by %c14_i32_42 dim 0 : vector<16x16xf32>, i32 -> vector<16x16xf32>
    %c2_i32_43 = arith.constant 2 : i32
    %103 = vector.broadcast %c2_i32_43 : i32 to vector<16x16xi32>
    %104 = arith.addi %16, %103 : vector<16x16xi32>
    %c0_i32_44 = arith.constant 0 : i32
    %105 = vector.broadcast %c0_i32_44 : i32 to vector<16x16xi32>
    %106 = arith.cmpi sge, %104, %105 : vector<16x16xi32>
    %c2_i32_45 = arith.constant 2 : i32
    %107 = vector.broadcast %c2_i32_45 : i32 to vector<16x16xi32>
    %108 = arith.addi %16, %107 : vector<16x16xi32>
    %c16_i32_46 = arith.constant 16 : i32
    %109 = vector.broadcast %c16_i32_46 : i32 to vector<16x16xi32>
    %110 = arith.cmpi slt, %108, %109 : vector<16x16xi32>
    %111 = arith.andi %106, %110 : vector<16x16xi1>
    %112 = arith.select %111, %102, %17 : vector<16x16xi1>, vector<16x16xf32>
    %113 = arith.maximumf %101, %112 : vector<16x16xf32>
    %114 = arith.mulf %11, %113 : vector<16x16xf32>
    %115 = arith.addf %114, %11 : vector<16x16xf32>
    %cst_47 = arith.constant 0.000000e+00 : f32
    %116 = vector.broadcast %cst_47 : f32 to vector<16x16xf32>
    %117 = arith.maximumf %115, %116 : vector<16x16xf32>
    %118 = arith.mulf %12, %113 : vector<16x16xf32>
    %119 = arith.addf %118, %12 : vector<16x16xf32>
    %cst_48 = arith.constant 0.000000e+00 : f32
    %120 = vector.broadcast %cst_48 : f32 to vector<16x16xf32>
    %121 = arith.maximumf %119, %120 : vector<16x16xf32>
    %cst_49 = arith.constant 2.500000e-01 : f32
    %122 = vector.broadcast %cst_49 : f32 to vector<16x16xf32>
    %123 = arith.mulf %121, %122 : vector<16x16xf32>
    %124 = arith.addf %117, %123 : vector<16x16xf32>
    %cst_50 = arith.constant 0.000000e+00 : f32
    %125 = vector.broadcast %cst_50 : f32 to vector<16x16xf32>
    %126 = arith.minimumf %124, %125 : vector<16x16xf32>
    %127 = math.absf %124 : vector<16x16xf32>
    %cst_51 = arith.constant 0.000000e+00 : f32
    %128 = vector.broadcast %cst_51 : f32 to vector<16x16xf32>
    %129 = arith.subf %128, %127 : vector<16x16xf32>
    %130 = math.exp %129 : vector<16x16xf32>
    %cst_52 = arith.constant 1.000000e+00 : f32
    %131 = vector.broadcast %cst_52 : f32 to vector<16x16xf32>
    %132 = arith.addf %131, %130 : vector<16x16xf32>
    %133 = math.log %132 : vector<16x16xf32>
    %134 = arith.subf %126, %133 : vector<16x16xf32>
    %cst_53 = arith.constant 2.500000e-01 : f32
    %135 = vector.broadcast %cst_53 : f32 to vector<16x16xf32>
    %136 = arith.mulf %14, %135 : vector<16x16xf32>
    %cst_54 = arith.constant 0.000000e+00 : f32
    %137 = vector.broadcast %cst_54 : f32 to vector<16x16xf32>
    %138 = arith.minimumf %136, %137 : vector<16x16xf32>
    %139 = math.absf %136 : vector<16x16xf32>
    %cst_55 = arith.constant 0.000000e+00 : f32
    %140 = vector.broadcast %cst_55 : f32 to vector<16x16xf32>
    %141 = arith.subf %140, %139 : vector<16x16xf32>
    %142 = math.exp %141 : vector<16x16xf32>
    %cst_56 = arith.constant 1.000000e+00 : f32
    %143 = vector.broadcast %cst_56 : f32 to vector<16x16xf32>
    %144 = arith.addf %143, %142 : vector<16x16xf32>
    %145 = math.log %144 : vector<16x16xf32>
    %146 = arith.subf %138, %145 : vector<16x16xf32>
    %c0_57 = arith.constant 0 : index
    %c0_58 = arith.constant 0 : index
    %c0_59 = arith.constant 0 : index
    %147 = vector.load %arg2[%c0_57, %c0_58, %c0_59] : memref<1x16x16xf32, #tpu.memory_space<vmem>>, vector<1x16x16xf32>
    %148 = vector.shape_cast %147 : vector<1x16x16xf32> to vector<16x16xf32>
    %cst_60 = arith.constant 2.500000e-01 : f32
    %149 = vector.broadcast %cst_60 : f32 to vector<16x16xf32>
    %150 = arith.mulf %148, %149 : vector<16x16xf32>
    %cst_61 = arith.constant 0.000000e+00 : f32
    %151 = vector.broadcast %cst_61 : f32 to vector<16x16xf32>
    %152 = arith.minimumf %150, %151 : vector<16x16xf32>
    %153 = math.absf %150 : vector<16x16xf32>
    %cst_62 = arith.constant 0.000000e+00 : f32
    %154 = vector.broadcast %cst_62 : f32 to vector<16x16xf32>
    %155 = arith.subf %154, %153 : vector<16x16xf32>
    %156 = math.exp %155 : vector<16x16xf32>
    %cst_63 = arith.constant 1.000000e+00 : f32
    %157 = vector.broadcast %cst_63 : f32 to vector<16x16xf32>
    %158 = arith.addf %157, %156 : vector<16x16xf32>
    %159 = math.log %158 : vector<16x16xf32>
    %160 = arith.subf %152, %159 : vector<16x16xf32>
    %161 = math.exp %160 : vector<16x16xf32>
    %cst_64 = arith.constant 2.000000e+00 : f32
    %162 = vector.broadcast %cst_64 : f32 to vector<16x16xf32>
    %163 = arith.mulf %162, %160 : vector<16x16xf32>
    %164 = arith.subf %163, %134 : vector<16x16xf32>
    %165 = arith.subf %164, %146 : vector<16x16xf32>
    %166 = arith.mulf %161, %165 : vector<16x16xf32>
    %cst_65 = arith.constant dense<0.000000e+00> : vector<16xf32>
    %167 = vector.multi_reduction <add>, %166, %cst_65 [0] : vector<16x16xf32> to vector<16xf32>
    %168 = vector.shape_cast %167 : vector<16xf32> to vector<1x16xf32>
    %169 = vector.shape_cast %168 : vector<1x16xf32> to vector<1x1x16xf32>
    %c0_66 = arith.constant 0 : index
    %c0_67 = arith.constant 0 : index
    %c0_68 = arith.constant 0 : index
    %170 = vector.load %arg8[%c0_66, %c0_67, %c0_68] : memref<1x1x16xf32, #tpu.memory_space<vmem>>, vector<1x1x16xf32>
    tpu.vector_store %arg8[%c0_66, %c0_67, %c0_68], %169 {strides = array<i32>} : memref<1x1x16xf32, #tpu.memory_space<vmem>>, vector<1x1x16xf32>,
    return
  }
  func.func @transform_0(%arg0: i32) -> (i32, i32, i32) {
    %c0_i32 = arith.constant 0 : i32
    %c0_i32_0 = arith.constant 0 : i32
    %c0_i32_1 = arith.constant 0 : i32
    return %arg0, %c0_i32, %c0_i32_0 : i32, i32, i32
  }
  func.func @transform_1(%arg0: i32) -> (i32, i32, i32) {
    %c0_i32 = arith.constant 0 : i32
    %c0_i32_0 = arith.constant 0 : i32
    %c0_i32_1 = arith.constant 0 : i32
    return %arg0, %c0_i32, %c0_i32_0 : i32, i32, i32
  }
  func.func @transform_2(%arg0: i32) -> (i32, i32, i32) {
    %c0_i32 = arith.constant 0 : i32
    %c0_i32_0 = arith.constant 0 : i32
    %c0_i32_1 = arith.constant 0 : i32
    return %arg0, %c0_i32, %c0_i32_0 : i32, i32, i32
  }
  func.func @transform_3(%arg0: i32) -> (i32, i32) {
    %c0_i32 = arith.constant 0 : i32
    %c0_i32_0 = arith.constant 0 : i32
    %c0_i32_1 = arith.constant 0 : i32
    return %c0_i32, %c0_i32_0 : i32, i32
  }
  func.func @transform_4(%arg0: i32) -> (i32, i32) {
    %c0_i32 = arith.constant 0 : i32
    %c0_i32_0 = arith.constant 0 : i32
    %c0_i32_1 = arith.constant 0 : i32
    return %c0_i32, %c0_i32_0 : i32, i32
  }
  func.func @transform_5(%arg0: i32) -> (i32, i32) {
    %c0_i32 = arith.constant 0 : i32
    %c0_i32_0 = arith.constant 0 : i32
    %c0_i32_1 = arith.constant 0 : i32
    return %c0_i32, %c0_i32_0 : i32, i32
  }
  func.func @transform_6(%arg0: i32) -> i32 {
    %c0_i32 = arith.constant 0 : i32
    %c0_i32_0 = arith.constant 0 : i32
    return %c0_i32 : i32
  }
  func.func @transform_7(%arg0: i32) -> (i32, i32, i32) {
    %c0_i32 = arith.constant 0 : i32
    %c0_i32_0 = arith.constant 0 : i32
    %c0_i32_1 = arith.constant 0 : i32
    return %arg0, %c0_i32, %c0_i32_0 : i32, i32, i32
  }
}

</mosaic_0001>

<bundles_post_ra>
// kernel: tpu_custom_call.1
= control target key start
LH: loop header
LB: loop body
LE: loop exit
PB: predicated region body
PF: predicated region fallthrough
CT: control target
= control target key end

     0   :  { %s1515_s0 = inlined_call_operand.vmem [shape: f32[2,16,16], index: 0, kind: input, shape index: {}]   ;;  %s1516_s1 = inlined_call_operand.vmem [shape: f32[2,16,16], index: 1, kind: input, shape index: {}]   ;;  %s1517_s2 = inlined_call_operand.vmem [shape: f32[2,4,256], index: 2, kind: input, shape index: {}]   ;;  %s1518_s3 = inlined_call_operand.vmem [shape: f32[256,2], index: 3, kind: input, shape index: {}]   ;;  %s1519_s4 = inlined_call_operand.vmem [shape: f32[2,16], index: 4, kind: input, shape index: {}]   ;;  %s1520_s5 = inlined_call_operand.vmem [shape: f32[32,4], index: 5, kind: input, shape index: {}]   ;;  %s1521_s6 = inlined_call_operand.<no memory space> [shape: f32[1], index: 6, kind: input, shape index: {}]   ;;  %s1522_s7 = inlined_call_operand.hbm [shape: f32[2,1,16], index: 7, kind: output, shape index: {}]  }
   0x1   :  { %12 = sst [smem:[#allocation2]] %s1521_s6 }
   0x2   :  { %13 = vsyncpa [#allocation4], 0 }
   0x3   :  { %15 = vsyncpa [#allocation4 + $0x1], 0  ;;  %s1248_s26 = smov 0   ;;  %s1250_s27 = smov 0  }
   0x4   :  { %s1252_s28 = smov 0   ;;  %s1254_s29 = smov 0  }
   0x5 LB: > { %s1269_s6 = sadd.s32 4294967295, %s1195_s29   ;;  %s948_s30 = sadd.s32 4294967294, %s1195_s29   ;;  %s1195_s29 = sphi %s1254_s29, %s1528_s29   ;;  %s1191_s28 = sphi %s1252_s28, %s1527_s28   ;;  %s1187_s27 = sphi %s1250_s27, %s1526_s27   ;;  %s1183_s26 = sphi %s1248_s26, %s1525_s26  }
   0x6   : > { %s1273_s8 = sadd.s32 1, %s1195_s29   ;;  %s190_s9 = sadd.s32 1, %s1191_s28 }
   0x7   : > { %s187_s10 = ssub.s32 %s1195_s29, %s1273_s8  ;;  %p200_p0 = scmp.ne.s32.totalorder %s1191_s28, %s1187_s27 }
   0x8   : > { %p188_p1 = scmp.eq.s32.totalorder %s187_s10, 0  ;;  %p201_p2 = scmp.eq.s32.totalorder %s1269_s6, 1 }
   0x9   : > { %p206_p3 = scmp.ne.s32.totalorder %s1187_s27, %s1183_s26  ;;  %p207_p4 = scmp.eq.s32.totalorder %s948_s30, 1 }
   0xa   : > { %s1284_s11 = scalar_select %p188_p1, %s1191_s28, %s190_s9  }
   0xb   : > { %p1286_p5 = por %p201_p2, %p200_p0  ;;  %p1290_p6 = por %p207_p4, %p206_p3 }
   0xc   : > { %p951_p7 = scmp.ge.s32.totalorder %s1195_s29, 1  ;;  %p261_p8 = scmp.lt.s32.totalorder %s1195_s29, 3 }
   0xe   : > { %p262_p9 = pnand %p951_p7, %p261_p8 }
   0xf   : > { %v335_v0 = vld [vmem:[%s1518_s3 + $0x80] sm:$0xff] (!%p262_p9)  ;;  %v336_v1 = vld [vmem:[%s1518_s3 + $0x88] sm:$0xff] (!%p262_p9)  ;;  %p302_p10 = scmp.lt.s32.totalorder (!%p262_p9), %s1269_s6, 1  ;;  %v337_v5 = vld [vmem:[%s1518_s3 + $0x90] sm:$0xff] (!%p262_p9)  ;;  %v1197_v50 = vmov (!%p262_p9), 0.0   ;;  %vm430_vm0 = vcmask (!%p262_p9), 1041408  }
  0x10   : > { %265 = sbr.rel (%p262_p9) target bundleno = 777 (0x309), region = 48  ;;  %v319_v2 = vld [vmem:[%s1518_s3] sm:$0xff] (!%p262_p9)  ;;  %v1026_v3 = vpack.c.bf16 (!%p262_p9), %v336_v1, %v335_v0  ;;  %v320_v4 = vld [vmem:[%s1518_s3 + $0x8] sm:$0xff] (!%p262_p9)  ;;  %v338_v6 = vld [vmem:[%s1518_s3 + $0x98] sm:$0xff] (!%p262_p9)  ;;  %1013 = vmatprep.subr.mxu1 (!%p262_p9), %v1197_v50  ;;  %vm1198_vm1 = vmmov (!%p262_p9), 0   ;;  %s1199_s19 = smov (!%p262_p9), 16  }
  0x11   : > { %v1028_v7 = vpack.c.bf16 (!%p262_p9), %v320_v4, %v319_v2  ;;  %v1030_v8 = vpack.c.bf16 (!%p262_p9), %v338_v6, %v337_v5  ;;  %v321_v9 = vld [vmem:[%s1518_s3 + $0x10] sm:$0xff] (!%p262_p9)  ;;  %v322_v10 = vld [vmem:[%s1518_s3 + $0x18] sm:$0xff] (!%p262_p9)  ;;  %v339_v11 = vld [vmem:[%s1518_s3 + $0xa0] sm:$0xff] (!%p262_p9)  ;;  %1015 = vmatprep.mubr.msk.f32.mxu1 (!%p262_p9), %vm1198_vm1, %v1197_v50  ;;  %vm617_vm2 = vcmask (!%p262_p9), 1047680   ;;  %vm426_vm3 = vcmask (!%p262_p9), 15360   ;;  %s1200_s23 = smov (!%p262_p9), 114  }
  0x12   : > { %1027 = vmatprep.subr.bf16.mxu0 (!%p262_p9), %v1026_v3  ;;  %v340_v12 = vld [vmem:[%s1518_s3 + $0xa8] sm:$0xff] (!%p262_p9)  ;;  %v1032_v13 = vpack.c.bf16 (!%p262_p9), %v322_v10, %v321_v9  ;;  %v323_v15 = vld [vmem:[%s1518_s3 + $0x20] sm:$0xff] (!%p262_p9)  ;;  %v341_v17 = vld [vmem:[%s1518_s3 + $0xb0] sm:$0xff] (!%p262_p9)  ;;  %vm508_vm4 = vcmask (!%p262_p9), 31744   ;;  %s1201_s24 = smov (!%p262_p9), 113   ;;  %s1202_s25 = smov (!%p262_p9), 127   ;;  %v612_v9 = vlaneseq (!%p262_p9) }
  0x13   : > { %1029 = vmatpush3.bf16.msra.mxu0 (!%p262_p9), %v1028_v7  ;;  %v1034_v14 = vpack.c.bf16 (!%p262_p9), %v340_v12, %v339_v11  ;;  %v324_v16 = vld [vmem:[%s1518_s3 + $0x28] sm:$0xff] (!%p262_p9)  ;;  %v342_v18 = vld [vmem:[%s1518_s3 + $0xb8] sm:$0xff] (!%p262_p9)  ;;  %v325_v21 = vld [vmem:[%s1518_s3 + $0x30] sm:$0xff] (!%p262_p9)  ;;  %s1203_s30 = smov (!%p262_p9), 126   ;;  %vm521_vm5 = vcmask (!%p262_p9), 1043456  }
  0x14   : > { %1031 = vmatprep.subr.bf16.mxu0 (!%p262_p9), %v1030_v8  ;;  %v1036_v19 = vpack.c.bf16 (!%p262_p9), %v324_v16, %v323_v15  ;;  %v1038_v20 = vpack.c.bf16 (!%p262_p9), %v342_v18, %v341_v17  ;;  %v326_v22 = vld [vmem:[%s1518_s3 + $0x38] sm:$0xff] (!%p262_p9)  ;;  %v343_v23 = vld [vmem:[%s1518_s3 + $0xc0] sm:$0xff] (!%p262_p9)  ;;  %v344_v24 = vld [vmem:[%s1518_s3 + $0xc8] sm:$0xff] (!%p262_p9)  ;;  %v613_v10 = vand.u32 (!%p262_p9), 127, %v612_v9 }
  0x15   : > { %v1040_v27 = vpack.c.bf16 (!%p262_p9), %v326_v22, %v325_v21  ;;  %v1042_v28 = vpack.c.bf16 (!%p262_p9), %v344_v24, %v343_v23  ;;  %v327_v29 = vld [vmem:[%s1518_s3 + $0x40] sm:$0xff] (!%p262_p9)  ;;  %v328_v30 = vld [vmem:[%s1518_s3 + $0x48] sm:$0xff] (!%p262_p9)  ;;  %v345_v31 = vld [vmem:[%s1518_s3 + $0xd0] sm:$0xff] (!%p262_p9) }
  0x16   : > { %v346_v32 = vld [vmem:[%s1518_s3 + $0xd8] sm:$0xff] (!%p262_p9)  ;;  %v1044_v33 = vpack.c.bf16 (!%p262_p9), %v328_v30, %v327_v29  ;;  %v329_v35 = vld [vmem:[%s1518_s3 + $0x50] sm:$0xff] (!%p262_p9)  ;;  %v347_v37 = vld [vmem:[%s1518_s3 + $0xe0] sm:$0xff] (!%p262_p9)  ;;  %v630_v11 = vadd.s32 (!%p262_p9), 4294967294, %v613_v10 }
  0x17   : > { %s1325_s17 = scalar_select %p302_p10, %s1269_s6, 1  ;;  %1033 = vmatpush3.bf16.msra.mxu0 %v1032_v13  ;;  %v1046_v34 = vpack.c.bf16 %v346_v32, %v345_v31  ;;  %v330_v36 = vld [vmem:[%s1518_s3 + $0x58] sm:$0xff]  ;;  %v348_v38 = vld [vmem:[%s1518_s3 + $0xe8] sm:$0xff]  ;;  %v331_v41 = vld [vmem:[%s1518_s3 + $0x60] sm:$0xff] }
  0x18   : > { %1035 = vmatprep.subr.bf16.mxu0 %v1034_v14  ;;  %v1048_v39 = vpack.c.bf16 %v330_v36, %v329_v35  ;;  %v1050_v40 = vpack.c.bf16 %v348_v38, %v347_v37  ;;  %v332_v42 = vld [vmem:[%s1518_s3 + $0x68] sm:$0xff]  ;;  %v349_v43 = vld [vmem:[%s1518_s3 + $0xf0] sm:$0xff]  ;;  %v350_v44 = vld [vmem:[%s1518_s3 + $0xf8] sm:$0xff]  ;;  %vm631_vm6 = vcmp.ge.s32.totalorder %v630_v11, 0  ;;  %vm632_vm7 = vcmp.lt.s32.totalorder %v630_v11, 16 }
  0x19   : > { %s970_s20 = sshll.u32 %s1325_s17, 3  ;;  %v1052_v45 = vpack.c.bf16 %v332_v42, %v331_v41  ;;  %v1054_v46 = vpack.c.bf16 %v350_v44, %v349_v43  ;;  %v333_v47 = vld [vmem:[%s1518_s3 + $0x70] sm:$0xff]  ;;  %v334_v48 = vld [vmem:[%s1518_s3 + $0x78] sm:$0xff]  ;;  %v425_v51 = vld [vmem:[%s1519_s4] sm:$0x3]  ;;  %v646_v14 = vadd.s32 4294967295, %v613_v10 }
  0x1a   : > { %s316_s16 = scalar_lea.vmem %s1517_s2, %s970_s20  ;;  %v1056_v49 = vpack.c.bf16 %v334_v48, %v333_v47  ;;  %s968_s20 = sshll.u32 %s1325_s17, 4  ;;  %1014 = vmatpush3.msk.msra.mxu1 %vm430_vm0, %v425_v51  ;;  %v504_v63 = vld [vmem:[%s1520_s5] sm:$0xff]  ;;  %v505_v5 = vld [vmem:[%s1520_s5 + $0x8] sm:$0xff]  ;;  %v506_v7 = vld [vmem:[%s1520_s5 + $0x10] sm:$0xff]  ;;  %v615_v37 = vshrl.u32 %v612_v9, 7 }
  0x1b   : > { %v317_v25 = vld [vmem:[%s316_s16] sm:$0xff]  ;;  %1037 = vmatpush3.bf16.msra.mxu0 %v1036_v19  ;;  %s306_s14 = scalar_lea.vmem %s1515_s0, %s968_s20  ;;  %s318_s16 = sld [smem:[#allocation2]]  ;;  %v507_v8 = vld [vmem:[%s1520_s5 + $0x18] sm:$0xff]  ;;  %vm633_vm8 = vmand %vm631_vm6, %vm632_vm7  ;;  %vm647_vm9 = vcmp.ge.s32.totalorder %v646_v14, 0  ;;  %vm648_vm10 = vcmp.lt.s32.totalorder %v646_v14, 16  ;;  %v660_v19 = vadd.s32 1, %v613_v10 }
  0x1c   : > { %v353_v26 = vcombine.high %v317_v25, %v317_v25  ;;  %1039 = vmatprep.subr.bf16.mxu0 %v1038_v20  ;;  %v1409_v52 = vld [vmem:[%s306_s14] sm:$0xff]  ;;  %v1412_v53 = vld [vmem:[%s306_s14 + $0x8] sm:$0xff]  ;;  %vm649_vm11 = vmand %vm647_vm9, %vm648_vm10  ;;  %s311_s22 = scalar_lea.vmem %s1516_s1, %s968_s20  ;;  %v693_v44 = vadd.s32 4294967294, %v615_v37  ;;  %vm690_vm14 = vcmp.lt.s32.totalorder %v615_v37, 2  ;;  %v616_v47 = vadd.s32 8, %v615_v37  ;;  %s300_s17 = sand.u32 1, %s1187_s27  }
  0x1d   : > { %618 = vrot.lane.b32.xlu0 %v1409_v52, %s1199_s19  ;;  %vm662_vm12 = vcmp.lt.s32.totalorder %v660_v19, 16  ;;  %v811_v41 = vld [vmem:[%s311_s22 + $0x8] sm:$0xff]  ;;  %v710_v51 = vadd.s32 4294967295, %v615_v37  ;;  %vm707_vm0 = vcmp.lt.s32.totalorder %v615_v37, 1  ;;  %vm724_vm1 = vcmp.lt.s32.totalorder %v615_v37, 7  ;;  %s965_s20 = sshll.u32 %s1269_s6, 4 }
  0x1e   : > { %419 = vmatprep.mubr.f32.mxu0 %v353_v26  ;;  %v674_v26 = vadd.s32 2, %v613_v10  ;;  %vm695_vm15 = vcmp.ge.s32.totalorder %v693_v44, 0  ;;  %vm844_vm6 = vcmask 130048   ;;  %vm854_vm7 = vcmask 122880   ;;  %s1473_s9 = scalar_lea.hbm %s1522_s7, %s965_s20  ;;  %s857_s10 = scalar_lea.sflag [#allocation4], %s300_s17 }
  0x1f   : > { %1041 = vmatpush3.bf16.msra.mxu0 %v1040_v27  ;;  %s1204_s6 = smov [#allocation3]  }
  0x20   : > { %1043 = vmatprep.subr.bf16.mxu0 %v1042_v28  ;;  %vm676_vm13 = vcmp.lt.s32.totalorder %v674_v26, 16  ;;  %s1137_s15 = sshll.u32 %s1204_s6, 4  ;;  %s1138_s15 = int_to_ptr.vmem [resolvable:$false] %s1137_s15 }
  0x21   : > { %621 = vrot.lane.b32.xlu0 %v1412_v53, %s1199_s19  ;;  %v351_v59 = vstv %s318_s16  ;;  %s1139_s18 = scalar_lea.vmem %s1138_s15, 32 }
  0x23   : > { %1045 = vmatpush3.bf16.msra.mxu0 %v1044_v33 }
  0x24   : > { %1047 = vmatprep.subr.bf16.mxu0 %v1046_v34 }
  0x27   : > { %1049 = vmatpush3.bf16.msra.mxu0 %v1048_v39 }
  0x28   : > { %1051 = vmatprep.subr.bf16.mxu0 %v1050_v40  ;;  %v810_v40 = vld [vmem:[%s311_s22] sm:$0xff] }
  0x2b   : > { %1053 = vmatpush3.bf16.msra.mxu0 %v1052_v45  ;;  %v1446_v45 = vmul.f32 0.25, %v810_v40 }
  0x2c   : > { %1055 = vmatprep.subr.bf16.mxu0 %v1054_v46  ;;  %v1448_v46 = vmul.f32 0.25, %v811_v41 }
  0x2f   : > { %1057 = vmatpush3.bf16.msra.mxu0 %v1056_v49 }
  0x32   : > { %420 = vmatmul.mubr.f32.vlgmr.msra.gmra.mrb[0].mxu0 %v317_v25 }
  0x8f   : > { %v619_v54 = vpop.permute.xlu0 %618 }
  0x90   : > { %v620_v55 = vsel %vm617_vm2, %v619_v54, %v1409_v52  ;;  %v816_v54 = vand.u32 2147483647, %v1446_v45 }
  0x91   : > { %624 = vrot.lane.b32.xlu1 %v620_v55, %s1199_s19  ;;  %v817_v55 = vand.u32 2147483647, %v1448_v46 }
  0x93   : > { %v622_v56 = vpop.permute.xlu0 %621 }
  0x94   : > { %v623_v57 = vsel %vm617_vm2, %v622_v56, %v1412_v53 }
  0x95   : > { %626 = vrot.lane.b32.xlu1 %v623_v57, %s1199_s19 }
 0x103   : > { %v625_v0 = vpop.permute.xlu1 %624 }
 0x104   : > { %v628_v1 = vsel %vm617_vm2, %v625_v0, %v1409_v52 }
 0x105   : > { %v1003_v58 = vpop.f32.mrb[0].mxu0  ;;  %636 = vrot.lane.b32.xlu0 %v628_v1, %s1200_s23 }
 0x106   : > { %v1004_v60 = vpop.f32.mrb[1].mxu0 }
 0x107   : > { %v1005_v61 = vadd.f32 %v1004_v60, %v1003_v58  ;;  %v627_v2 = vpop.permute.xlu1 %626 }
 0x108   : > { %v629_v3 = vsel %vm617_vm2, %v627_v2, %v1412_v53  ;;  %vm712_vm2 = vcmp.ge.s32.totalorder %v710_v51, 0 }
 0x109   : > { %v422_v62 = vadd.f32 %v1005_v61, %v351_v59  ;;  %638 = vrot.lane.b32.xlu1 %v629_v3, %s1200_s23  ;;  %650 = vrot.lane.b32.xlu0 %v628_v1, %s1201_s24  ;;  %v728_v59 = vadd.s32 1, %v616_v47  ;;  %s301_s23 = scalar_lea.vmem [#allocation3], %s300_s17 }
 0x10b   : > { %1016 = vmatmul.mubr.msk.f32.vlgmr.msra.gmra.mrb[0].mxu1 %vm426_vm3, %v422_v62  ;;  %v818_v62 = vsub.f32 0.0, %v816_v54  ;;  %vm732_vm3 = vcmp.lt.s32.totalorder %v728_v59, 16 }
 0x10c   : > { %1020 = vmatprep.mubr.msk.f32.mxu1 %vm508_vm4, %v504_v63  ;;  %v819_v63 = vsub.f32 0.0, %v817_v55 }
 0x10d   : > { %652 = vrot.lane.b32.xlu1 %v629_v3, %s1201_s24  ;;  %664 = vrot.lane.b32.xlu0 %v628_v1, %s1202_s25  ;;  %s869_s24 = sshll.u32 %s301_s23, 4  ;;  %s1475_s24 = int_to_ptr.vmem [resolvable:$true] %s869_s24 }
 0x10e   : > { %v822_v9 = vmul.f32 1.442695, %v819_v63  ;;  %s1133_s14 = scalar_lea.vmem %s1475_s24, 16  ;;  %p1140_p0 = scmp.lt.s32.totalorder %s1475_s24, %s1138_s15 }
 0x10f   : > { %p1134_p11 = scmp.ne.s32.totalorder %s1475_s24, %s1133_s14  ;;  %p1141_p1 = scmp.lt.s32.totalorder %s1139_s18, %s1133_s14 }
 0x110   : > { %1105 = vpow2.f32 %v822_v9 }
 0x111   : > { %666 = vrot.lane.b32.xlu1 %v629_v3, %s1202_s25  ;;  %678 = vrot.lane.b32.xlu0 %v628_v1, %s1203_s30  ;;  %p1135_p12 = pnand %p1134_p11, %p1286_p5  ;;  %p1142_p2 = por %p1141_p1, %p1140_p0 }
 0x113   : > { %p1136_p13 = pneg %p1135_p12 }
 0x115   : > { %680 = vrot.lane.b32.xlu1 %v629_v3, %s1203_s30  ;;  %p1143_p3 = pnand %p1142_p2, %p1136_p13 }
 0x177   : > { %v637_v13 = vpop.permute.xlu0 %636 }
 0x178   : > { %v642_v18 = vsel %vm633_vm8, %v637_v13, -inf }
 0x179   : > { %v644_v21 = vmax.f32 %v1409_v52, %v642_v18 }
 0x17b   : > { %v639_v12 = vpop.permute.xlu1 %638  ;;  %v651_v16 = vpop.permute.xlu0 %650 }
 0x17c   : > { %v643_v17 = vsel %vm633_vm8, %v639_v12, -inf  ;;  %v656_v25 = vsel %vm649_vm11, %v651_v16, -inf  ;;  %v820_v12 = vmul.f32 1.442695, %v818_v62 }
 0x17d   : > { %v645_v20 = vmax.f32 %v1412_v53, %v643_v17  ;;  %v658_v28 = vmax.f32 %v644_v21, %v656_v25  ;;  %v1459_v17 = vmul.f32 0.25, %v1409_v52 }
 0x17e   : > { %1107 = vpow2.f32 %v820_v12 }
 0x17f   : > { %v653_v15 = vpop.permute.xlu1 %652  ;;  %v665_v23 = vpop.permute.xlu0 %664  ;;  %v794_v25 = vand.u32 2147483647, %v1459_v17 }
 0x180   : > { %v657_v24 = vsel %vm649_vm11, %v653_v15, -inf  ;;  %v670_v30 = vsel %vm662_vm12, %v665_v23, -inf  ;;  %v1456_v15 = vmul.f32 0.25, %v1412_v53 }
 0x181   : > { %v659_v27 = vmax.f32 %v645_v20, %v657_v24  ;;  %v672_v34 = vmax.f32 %v658_v28, %v670_v30 }
 0x183   : > { %v667_v22 = vpop.permute.xlu1 %666  ;;  %v679_v32 = vpop.permute.xlu0 %678 }
 0x184   : > { %v671_v29 = vsel %vm662_vm12, %v667_v22, -inf  ;;  %v684_v36 = vsel %vm676_vm13, %v679_v32, -inf  ;;  %v795_v22 = vand.u32 2147483647, %v1456_v15 }
 0x185   : > { %v673_v33 = vmax.f32 %v659_v27, %v671_v29  ;;  %v686_v39 = vmax.f32 %v672_v34, %v684_v36 }
 0x186   : > { %v797_v29 = vsub.f32 0.0, %v795_v22 }
 0x187   : > { %v681_v31 = vpop.permute.xlu1 %680  ;;  %v688_v43 = vrot.slane %v686_v39, 6  ;;  %v705_v48 = vrot.slane %v686_v39, 7  ;;  %v722_v57 = vrot.slane %v686_v39, 1 }
 0x188   : > { %v685_v35 = vsel %vm676_vm13, %v681_v31, -inf  ;;  %v796_v31 = vsub.f32 0.0, %v794_v25 }
 0x189   : > { %v687_v38 = vmax.f32 %v673_v33, %v685_v35  ;;  %v1106_v35 = vpop.eup %1105 }
 0x18a   : > { %v798_v41 = vmul.f32 1.442695, %v796_v31 }
 0x18b   : > { %v689_v42 = vrot.slane %v687_v38, 6  ;;  %v706_v49 = vrot.slane %v687_v38, 7  ;;  %v723_v58 = vrot.slane %v687_v38, 1 }
 0x18d   : > { %v692_v50 = vsel %vm690_vm14, %v689_v42, %v688_v43  ;;  %v691_v56 = vsel %vm690_vm14, %v688_v43, %v689_v42  ;;  %v709_v61 = vsel %vm707_vm0, %v706_v49, %v705_v48  ;;  %v708_v1 = vsel %vm707_vm0, %v705_v48, %v706_v49 }
 0x18e   : > { %v701_v60 = vsel %vm695_vm15, %v692_v50, -inf  ;;  %v704_v0 = vmax.f32 %v687_v38, %v691_v56  ;;  %v726_v2 = vsel %vm724_vm1, %v723_v58, %v722_v57  ;;  %v725_v14 = vsel %vm724_vm1, %v722_v57, %v723_v58 }
 0x18f   : > { %v703_v3 = vmax.f32 %v686_v39, %v701_v60  ;;  %v736_v10 = vsel %vm732_vm3, %v726_v2, -inf  ;;  %v825_v43 = vadd.f32 1.0, %v1106_v35 }
 0x1de   : > { %v500_v4 = vpop.f32.mrb[0].mxu1 }
 0x1df   : > { %v1017_v6 = vpop.f32.mrb[1].mxu1  ;;  %1018 = vmatprep.subr.msk.mxu1 %vm521_vm5, %v500_v4 }
 0x1e0   : > { %1019 = vmatpush3.msk.msra.mxu1 %vm521_vm5, %v500_v4  ;;  %v739_v4 = vrot.slane %v686_v39, 2  ;;  %v745_v6 = vadd.s32 2, %v616_v47  ;;  %v800_v39 = vmul.f32 1.442695, %v797_v29 }
 0x1e1   : > { %1021 = vmatmul.mubr.msk.f32.vlgmr.msra.gmra.mrb[2].mxu1 %vm508_vm4, %v505_v5  ;;  %v740_v5 = vrot.slane %v687_v38, 2  ;;  %v1108_v38 = vpop.eup %1107 }
 0x1e2   : > { %1023 = vmatprep.mubr.msk.f32.mxu1 %vm508_vm4, %v506_v7  ;;  %v718_v7 = vsel %vm712_vm2, %v709_v61, -inf  ;;  %vm749_vm5 = vcmp.lt.s32.totalorder %v745_v6, 16  ;;  %v824_v48 = vadd.f32 1.0, %v1108_v38  ;;  %1109 = vpow2.f32 %v800_v39 }
 0x1e3   : > { %v720_v11 = vmax.f32 %v703_v3, %v718_v7  ;;  %1111 = vpow2.f32 %v798_v41  ;;  %v815_v3 = vmin.f32 %v1448_v46, 0.0  ;;  %v793_v46 = vmin.f32 %v1456_v15, 0.0 }
 0x1e4   : > { %1113 = vlog2.f32 %v825_v43 }
 0x1e5   : > { %1024 = vmatmul.mubr.msk.f32.gmra.mrb[4].mxu1 %vm508_vm4, %v507_v8  ;;  %vm741_vm4 = vcmp.lt.s32.totalorder %v615_v37, 6  ;;  %v721_v8 = vmax.f32 %v704_v0, %v708_v1  ;;  %v737_v19 = vmax.f32 %v720_v11, %v725_v14  ;;  %1115 = vlog2.f32 %v824_v48 }
 0x1e6   : > { %v743_v13 = vsel %vm741_vm4, %v740_v5, %v739_v4  ;;  %v742_v20 = vsel %vm741_vm4, %v739_v4, %v740_v5  ;;  %v814_v5 = vmin.f32 %v1446_v45, 0.0 }
 0x1e7   : > { %v738_v16 = vmax.f32 %v721_v8, %v736_v10  ;;  %v753_v18 = vsel %vm749_vm5, %v743_v13, -inf  ;;  %v754_v26 = vmax.f32 %v737_v19, %v742_v20  ;;  %v792_v20 = vmin.f32 %v1459_v17, 0.0 }
 0x1e9   : > { %v755_v23 = vmax.f32 %v738_v16, %v753_v18 }
 0x1ec   : > { %v1110_v61 = vpop.eup %1109 }
 0x1ed   : > { %v1112_v62 = vpop.eup %1111  ;;  %v803_v1 = vadd.f32 1.0, %v1110_v61 }
 0x1ee   : > { %v1114_v63 = vpop.eup %1113  ;;  %v802_v2 = vadd.f32 1.0, %v1112_v62 }
 0x1ef   : > { %v1116_v0 = vpop.eup %1115  ;;  %v829_v4 = vmul.f32 0.6931472, %v1114_v63 }
 0x1f0   : > { %v827_v6 = vmul.f32 0.6931472, %v1116_v0 }
 0x1f1   : > { %v831_v9 = vsub.f32 %v815_v3, %v829_v4 }
 0x1f2   : > { %v830_v11 = vsub.f32 %v814_v5, %v827_v6 }
 0x1f3   : > { %v834_v13 = vmul.f32 1.442695, %v831_v9  ;;  %v837_v25 = vmul.f32 2.0, %v831_v9 }
 0x1f4   : > { %v832_v14 = vmul.f32 1.442695, %v830_v11 }
 0x2b4   : > { %v1022_v21 = vpop.f32.mrb[2].mxu1 }
 0x2b5   : > { %v591_v24 = vpop.f32.mrb[3].mxu1  ;;  %v757_v53 = vmul.f32 %v1022_v21, %v755_v23 }
 0x2b6   : > { %v756_v27 = vmul.f32 %v754_v26, %v591_v24 }
 0x2b7   : > { %v759_v33 = vadd.f32 %v1022_v21, %v757_v53 }
 0x2b8   : > { %v1025_v28 = vpop.f32.mrb[4].mxu1  ;;  %v758_v36 = vadd.f32 %v756_v27, %v591_v24  ;;  %v836_v27 = vmul.f32 2.0, %v830_v11 }
 0x2b9   : > { %v763_v30 = vmul.f32 %v1025_v28, %v755_v23  ;;  %v601_v52 = vpop.f32.mrb[5].mxu1  ;;  %v761_v44 = vmax.f32 %v759_v33, 0.0 }
 0x2ba   : > { %v762_v32 = vmul.f32 %v754_v26, %v601_v52  ;;  %v760_v49 = vmax.f32 %v758_v36, 0.0 }
 0x2bb   : > { %v765_v34 = vadd.f32 %v1025_v28, %v763_v30 }
 0x2bc   : > { %v764_v37 = vadd.f32 %v762_v32, %v601_v52 }
 0x2bd   : > { %v767_v40 = vmax.f32 %v765_v34, 0.0 }
 0x2be   : > { %v766_v42 = vmax.f32 %v764_v37, 0.0 }
 0x2bf   : > { %v769_v47 = vmul.f32 0.25, %v767_v40 }
 0x2c0   : > { %v768_v50 = vmul.f32 0.25, %v766_v42 }
 0x2c1   : > { %v771_v51 = vadd.f32 %v769_v47, %v761_v44 }
 0x2c2   : > { %v770_v54 = vadd.f32 %v768_v50, %v760_v49 }
 0x2c3   : > { %v775_v55 = vand.u32 2147483647, %v771_v51  ;;  %v773_v23 = vmin.f32 %v771_v51, 0.0 }
 0x2c4   : > { %v774_v56 = vand.u32 2147483647, %v770_v54  ;;  %v772_v26 = vmin.f32 %v770_v54, 0.0 }
 0x2c5   : > { %v777_v57 = vsub.f32 0.0, %v775_v55 }
 0x2c6   : > { %v776_v58 = vsub.f32 0.0, %v774_v56 }
 0x2c7   : > { %v780_v59 = vmul.f32 1.442695, %v777_v57 }
 0x2c8   : > { %v778_v60 = vmul.f32 1.442695, %v776_v58 }
 0x2c9   : > { %1117 = vpow2.f32 %v780_v59 }
 0x2ca   : > { %1119 = vpow2.f32 %v778_v60 }
 0x2cb   : > { %1121 = vlog2.f32 %v803_v1 }
 0x2cc   : > { %1123 = vlog2.f32 %v802_v2 }
 0x2d3   : > { %v1118_v7 = vpop.eup %1117 }
 0x2d4   : > { %v1120_v8 = vpop.eup %1119  ;;  %v783_v10 = vadd.f32 1.0, %v1118_v7 }
 0x2d5   : > { %v782_v12 = vadd.f32 1.0, %v1120_v8  ;;  %v1122_v16 = vpop.eup %1121 }
 0x2d6   : > { %1125 = vlog2.f32 %v783_v10  ;;  %v1124_v18 = vpop.eup %1123  ;;  %v807_v45 = vmul.f32 0.6931472, %v1122_v16 }
 0x2d7   : > { %1127 = vlog2.f32 %v782_v12  ;;  %v805_v21 = vmul.f32 0.6931472, %v1124_v18 }
 0x2d8   : > { %1129 = vpow2.f32 %v834_v13  ;;  %v809_v29 = vsub.f32 %v793_v46, %v807_v45 }
 0x2d9   : > { %1131 = vpow2.f32 %v832_v14  ;;  %v808_v52 = vsub.f32 %v792_v20, %v805_v21 }
 0x2e0   : > { %v1126_v19 = vpop.eup %1125 }
 0x2e1   : > { %v1128_v22 = vpop.eup %1127  ;;  %v787_v24 = vmul.f32 0.6931472, %v1126_v19 }
 0x2e2   : > { %v785_v53 = vmul.f32 0.6931472, %v1128_v22  ;;  %v1130_v32 = vpop.eup %1129 }
 0x2e3   : > { %v789_v28 = vsub.f32 %v773_v23, %v787_v24  ;;  %v1132_v33 = vpop.eup %1131 }
 0x2e4   : > { %v788_v30 = vsub.f32 %v772_v26, %v785_v53 }
 0x2e5   : > { %v839_v31 = vsub.f32 %v837_v25, %v789_v28 }
 0x2e6   : > { %v838_v15 = vsub.f32 %v836_v27, %v788_v30 }
 0x2e7   : > { %v841_v34 = vsub.f32 %v839_v31, %v809_v29 }
 0x2e8   : > { %v840_v17 = vsub.f32 %v838_v15, %v808_v52 }
 0x2e9   : > { %v843_v35 = vmul.f32 %v1130_v32, %v841_v34 }
 0x2ea   : > { %v842_v36 = vmul.f32 %v1132_v33, %v840_v17 }
 0x2eb   : > { %v846_v37 = vsel %vm844_vm6, %v843_v35, 0.0 }
 0x2ec   : > { %v845_v38 = vsel %vm844_vm6, %v842_v36, 0.0 }
 0x2ed   : > { %v847_v39 = vadd.f32 %v846_v37, %v845_v38 }
 0x2ef   : > { %v848_v40 = vrot.slane %v847_v39, 4 }
 0x2f1   : > { %v849_v41 = vadd.f32 %v848_v40, %v847_v39 }
 0x2f3   : > { %v850_v42 = vrot.slane %v849_v41, 2 }
 0x2f5   : > { %v851_v43 = vadd.f32 %v850_v42, %v849_v41 }
 0x2f7   : > { %v852_v44 = vrot.slane %v851_v43, 1 }
 0x2f9   : > { %v853_v47 = vadd.f32 %v852_v44, %v851_v43 }
 0x2fb   : > { %855 = vst.msk [vmem:[%s301_s23] sm:$0x1] %vm854_vm7, %v853_v47 }
 0x2fc   : > { %1146 = shalt.err (!%p1143_p3)
}
 0x2fd   : > { %s1147_s19 = scalar_lea.hbm %s1473_s9, 16  ;;  %s1151_s22 = scalar_lea.hbm %s1522_s7, 32 }
 0x2fe   : > { %p1148_p4 = scmp.ne.s32.totalorder %s1473_s9, %s1147_s19  ;;  %p1152_p9 = scmp.lt.u32.totalorder %s1473_s9, %s1522_s7 }
 0x2ff   : > { %p1153_p10 = scmp.lt.u32.totalorder %s1151_s22, %s1147_s19  ;;  %p1155_p12 = scmp.lt.u32.totalorder %s1147_s19, %s1473_s9 }
 0x300   : > { %p1149_p7 = pnand %p1148_p4, %p1286_p5 }
 0x301   : > { %p1154_p11 = por %p1153_p10, %p1152_p9 }
 0x302   : > { %p1150_p8 = pneg %p1149_p7 }
 0x303   : > { %p1156_p13 = por %p1155_p12, %p1154_p11 }
 0x305   : > { %p1157_p0 = pnand %p1156_p13, %p1150_p8 }
 0x307   : > { %1160 = shalt.err (!%p1157_p0)
}
 0x308   : > { %1058 = dma.vmem_to_hbm [thread:$0]  (%p1286_p5), %s1475_s24, 16, %s1473_s9, %s857_s10  }
 0x309 PF: > { %p1064_p1 = scmp.ge.s32.totalorder %s1195_s29, 2  ;;  %s881_s23 = sand.u32 1, %s1183_s26  }
 0x30a   : > { %s882_s25 = scalar_lea.sflag [#allocation4], %s881_s23 }
 0x30b   : > { %p1061_p2 = pnand %p1064_p1, %p1290_p6 }
 0x30d   : > { %1178 = dma.done.wait (!%p1061_p2), %s882_s25, 16  }
 0x30e   : > { %1180 = vsyncadd (!%p1061_p2), %s882_s25, 4294967280  ;;  %p18_p3 = scmp.ge.s32.totalorder %s1273_s8, 4   ;;  %s1525_s26 = smov %s1187_s27 }
 0x30f   : > { %s1526_s27 = smov %s1191_s28  ;;  %s1527_s28 = smov %s1284_s11 }
 0x310   : > { %s1528_s29 = smov %s1273_s8  ;;  %20 = sbr.rel (!%p18_p3) target bundleno = 5 (0x5), region = 89 }
 0x317   :  { %886 = vsyncpa [#allocation4], 1 }
 0x318   :  { %888 = vsyncpa [#allocation4 + $0x1], 1 }

</bundles_post_ra>
